<compile_context>
chip_gen: v7x
topology: tpu7x:2x2x1
jax: 0.10.0
libtpu: 0.0.40
codegen_flags: <defaults>
</compile_context>

<pallas_src>
import functools

import jax
import jax.numpy as jnp
from jax.experimental import pallas as pl
from jax.experimental.pallas import tpu as pltpu

# ---- Module constants (consistent with the (B, 36, 36) view) ----
LATENT_SPACE_SAMPLE = 16
ONE_HOT_ENCODING = False
DATA_DIMENSION = 36 * 36 * (4 if ONE_HOT_ENCODING else 1)  # 1296

H1 = 36
H2 = 144

# Batch tile cap: bf16 output block TM*1296*2 B double-buffered ~= 5.3 MiB at
# TM=1024 -> fits the 32 MiB scoped-VMEM default on v5e/v6e/v7x with room to spare.
TM_MAX = 1024
SUBLANE = 16  # bf16 sublane packing; also satisfies f32's 8-row requirement.


def _round_up(n, m):
    return (n + m - 1) // m * m


def _choose_tiling(batch):
    """Pick (tm, num_tiles, b_pad): minimal padding, >=2 tiles for v7x megacore."""
    b_min = _round_up(max(batch, SUBLANE), SUBLANE)
    num_tiles = pl.cdiv(b_min, TM_MAX)
    # Give each v7x TensorCore its own tile when there is enough work.
    if num_tiles == 1 and b_min >= 2 * SUBLANE:
        num_tiles = 2
    tm = _round_up(pl.cdiv(b_min, num_tiles), SUBLANE)
    return tm, num_tiles, tm * num_tiles


def generator_kernel(x_ref, w1_ref, b1_ref, w2_ref, b2_ref, w3_ref, b3_ref, out_ref):
    """Fused MLP: Linear -> LeakyReLU(0.2) -> Linear -> LeakyReLU(0.2) -> Linear.

    Dot operands are bf16 (fast MXU path on every generation) with f32
    accumulation; bias adds and LeakyReLU run in f32 on the VPU (v5e-safe).
    The output is cast to out_ref.dtype (bf16 by default) only at the store.
    """
    x = x_ref[...]  # (TM, 16) bf16

    h1 = jnp.dot(x, w1_ref[...], preferred_element_type=jnp.float32) + b1_ref[...]
    h1 = jnp.maximum(h1, 0.2 * h1)  # LeakyReLU(0.2)

    h2 = jnp.dot(h1.astype(jnp.bfloat16), w2_ref[...],
                 preferred_element_type=jnp.float32) + b2_ref[...]
    h2 = jnp.maximum(h2, 0.2 * h2)  # LeakyReLU(0.2)

    out = jnp.dot(h2.astype(jnp.bfloat16), w3_ref[...],
                  preferred_element_type=jnp.float32) + b3_ref[...]
    out_ref[...] = out.astype(out_ref.dtype)


@functools.partial(jax.jit, static_argnames=("flat_output", "out_dtype"))
def generator_forward(x, params, flat_output=True, out_dtype=jnp.bfloat16):
    """Batch-tiled fused Pallas kernel.

    flat_output=True (default, perf path) returns the lane-dense (B, 1296) slab;
    flat_output=False applies the module's (B, 36, 36) view as plain-JAX glue.
    """
    w1, b1, w2, b2, w3, b3 = params
    B = x.shape[0]

    tm, num_tiles, b_pad = _choose_tiling(B)

    x_bf = x.astype(jnp.bfloat16)
    if b_pad != B:
        x_bf = jnp.pad(x_bf, ((0, b_pad - B), (0, 0)))

    out_bytes = jnp.dtype(out_dtype).itemsize

    # Advisory cost hint for XLA's scheduler around the custom call.
    flops = 2 * b_pad * (LATENT_SPACE_SAMPLE * H1 + H1 * H2 + H2 * DATA_DIMENSION)
    bytes_accessed = (
        b_pad * LATENT_SPACE_SAMPLE * 2                       # bf16 input
        + (w1.size + w2.size + w3.size) * 2                   # bf16 weights
        + (b1.size + b2.size + b3.size) * 4                   # f32 biases
        + b_pad * DATA_DIMENSION * out_bytes                  # output
    )

    # Weights/biases: constant index_map -> resident in VMEM across grid steps.
    def resident(shape):
        return pl.BlockSpec(shape, lambda i: (0, 0))

    flat = pl.pallas_call(
        generator_kernel,
        out_shape=jax.ShapeDtypeStruct((b_pad, DATA_DIMENSION), out_dtype),
        grid=(num_tiles,),
        in_specs=[
            pl.BlockSpec((tm, LATENT_SPACE_SAMPLE), lambda i: (i, 0)),  # x tile
            resident((LATENT_SPACE_SAMPLE, H1)),                        # w1
            resident((1, H1)),                                          # b1
            resident((H1, H2)),                                         # w2
            resident((1, H2)),                                          # b2
            resident((H2, DATA_DIMENSION)),                             # w3
            resident((1, DATA_DIMENSION)),                              # b3
        ],
        out_specs=pl.BlockSpec((tm, DATA_DIMENSION), lambda i: (i, 0)),
        compiler_params=pltpu.CompilerParams(
            dimension_semantics=("parallel",),  # batch tiles shard across v7x's 2 TCs
        ),
        cost_estimate=pl.CostEstimate(
            flops=flops, transcendentals=0, bytes_accessed=bytes_accessed),
    )(
        x_bf,
        w1.astype(jnp.bfloat16), b1,   # no-op casts when params are prepared
        w2.astype(jnp.bfloat16), b2,
        w3.astype(jnp.bfloat16), b3,
    )

    if b_pad != B:
        flat = flat[:B]

    if flat_output:
        # Perf path: lane-dense (B, 1296). The 36-lane view below forces a
        # lane-padded relayout downstream (extra HBM pass) -- only do it on request.
        return flat
    if ONE_HOT_ENCODING:
        return flat.reshape(B, 36, 36, 4)
    return flat.reshape(B, 36, 36)


def init_params(key):
    """Deterministic synthetic parameters (PyTorch-Linear-like uniform init), f32."""
    keys = jax.random.split(key, 6)

    def lin(kw, kb, fan_in, fan_out):
        bound = 1.0 / jnp.sqrt(fan_in)
        w = jax.random.uniform(kw, (fan_in, fan_out), jnp.float32, -bound, bound)
        b = jax.random.uniform(kb, (1, fan_out), jnp.float32, -bound, bound)
        return w, b

    w1, b1 = lin(keys[0], keys[1], LATENT_SPACE_SAMPLE, H1)
    w2, b2 = lin(keys[2], keys[3], H1, H2)
    w3, b3 = lin(keys[4], keys[5], H2, DATA_DIMENSION)
    return (w1, b1, w2, b2, w3, b3)


def prepare_params(params):
    """One-time cast: weights -> bf16 (MXU operands), biases stay f32."""
    w1, b1, w2, b2, w3, b3 = params
    return (w1.astype(jnp.bfloat16), b1,
            w2.astype(jnp.bfloat16), b2,
            w3.astype(jnp.bfloat16), b3)


def reference_forward(x, params):
    """Pure-JAX reference with the same bf16-operand / f32-accumulate math (f32 out)."""
    w1, b1, w2, b2, w3, b3 = params
    h = jnp.dot(x.astype(jnp.bfloat16), w1.astype(jnp.bfloat16),
                preferred_element_type=jnp.float32) + b1
    h = jnp.maximum(h, 0.2 * h)
    h = jnp.dot(h.astype(jnp.bfloat16), w2.astype(jnp.bfloat16),
                preferred_element_type=jnp.float32) + b2
    h = jnp.maximum(h, 0.2 * h)
    out = jnp.dot(h.astype(jnp.bfloat16), w3.astype(jnp.bfloat16),
                  preferred_element_type=jnp.float32) + b3
    if ONE_HOT_ENCODING:
        return out.reshape(x.shape[0], 36, 36, 4)
    return out.reshape(x.shape[0], 36, 36)


if __name__ == "__main__":
    key = jax.random.PRNGKey(0)
    k_params, k_x = jax.random.split(key)

    params_f32 = init_params(k_params)
    params = prepare_params(params_f32)

    batch = 2
    x = jax.random.normal(k_x, (batch, LATENT_SPACE_SAMPLE), dtype=jnp.float32)

    # Perf path: lane-dense (B, 1296) bf16 slab from the kernel.
    flat = jax.block_until_ready(generator_forward(x, params))
    assert flat.shape == (batch, DATA_DIMENSION), flat.shape
    assert flat.dtype == jnp.bfloat16, flat.dtype

    # Module-spec view (plain-JAX glue) checked against the pure-JAX reference.
    out = flat.astype(jnp.float32).reshape(batch, 36, 36)
    ref = reference_forward(x, params_f32)
    assert out.shape == (batch, 36, 36), out.shape
    assert jnp.allclose(out, ref, atol=2e-2, rtol=2e-2), "mismatch vs reference"

    # Also exercise the module-shaped return path once.
    out_view = jax.block_until_ready(generator_forward(x, params, flat_output=False))
    assert out_view.shape == (batch, 36, 36), out_view.shape

    print("KERNEL_OK")
</pallas_src>

<mosaic_0001>
module attributes {stable_mosaic.version = 11 : i64} {
  func.func @generator_kernel(%arg0: i32, %arg1: memref<16x16xbf16, #tpu.memory_space<vmem>>, %arg2: memref<16x36xbf16, #tpu.memory_space<vmem>>, %arg3: memref<1x36xf32, #tpu.memory_space<vmem>>, %arg4: memref<36x144xbf16, #tpu.memory_space<vmem>>, %arg5: memref<1x144xf32, #tpu.memory_space<vmem>>, %arg6: memref<144x1296xbf16, #tpu.memory_space<vmem>>, %arg7: memref<1x1296xf32, #tpu.memory_space<vmem>>, %arg8: memref<16x1296xbf16, #tpu.memory_space<vmem>>) attributes {dimension_semantics = [#tpu.dimension_semantics<parallel>], iteration_bounds = array<i64: 1>, scalar_prefetch = 0 : i64, scratch_operands = 0 : i64, tpu.core_type = #tpu.core_type<tc>, window_params = [{transform_indices = @transform_0, window_bounds = array<i64: 16, 16>}, {pipeline_mode = #tpu.pipeline_mode<synchronous>, transform_indices = @transform_1, window_bounds = array<i64: 16, 36>}, {pipeline_mode = #tpu.pipeline_mode<synchronous>, transform_indices = @transform_2, window_bounds = array<i64: 1, 36>}, {pipeline_mode = #tpu.pipeline_mode<synchronous>, transform_indices = @transform_3, window_bounds = array<i64: 36, 144>}, {pipeline_mode = #tpu.pipeline_mode<synchronous>, transform_indices = @transform_4, window_bounds = array<i64: 1, 144>}, {pipeline_mode = #tpu.pipeline_mode<synchronous>, transform_indices = @transform_5, window_bounds = array<i64: 144, 1296>}, {pipeline_mode = #tpu.pipeline_mode<synchronous>, transform_indices = @transform_6, window_bounds = array<i64: 1, 1296>}, {transform_indices = @transform_7, window_bounds = array<i64: 16, 1296>}]} {
    %c0 = arith.constant 0 : index
    %c0_0 = arith.constant 0 : index
    %0 = vector.load %arg1[%c0, %c0_0] : memref<16x16xbf16, #tpu.memory_space<vmem>>, vector<16x16xbf16>
    %c0_1 = arith.constant 0 : index
    %c0_2 = arith.constant 0 : index
    %1 = vector.load %arg2[%c0_1, %c0_2] : memref<16x36xbf16, #tpu.memory_space<vmem>>, vector<16x36xbf16>
    %cst = arith.constant dense<0.000000e+00> : vector<16x36xf32>
    %2 = tpu.matmul %0, %1, %cst {dimension_numbers = #tpu.dot_dimension_numbers<[1], [0], [0], [1], [0, 0, 1, 1], [], []>} : vector<16x16xbf16>, vector<16x36xbf16>, vector<16x36xf32> -> vector<16x36xf32>
    %c0_3 = arith.constant 0 : index
    %c0_4 = arith.constant 0 : index
    %3 = vector.load %arg3[%c0_3, %c0_4] : memref<1x36xf32, #tpu.memory_space<vmem>>, vector<1x36xf32>
    %4 = vector.broadcast %3 : vector<1x36xf32> to vector<16x36xf32>
    %5 = arith.addf %2, %4 : vector<16x36xf32>
    %cst_5 = arith.constant 2.000000e-01 : f32
    %6 = vector.broadcast %cst_5 : f32 to vector<16x36xf32>
    %7 = arith.mulf %6, %5 : vector<16x36xf32>
    %8 = arith.maximumf %5, %7 : vector<16x36xf32>
    %9 = arith.truncf %8 : vector<16x36xf32> to vector<16x36xbf16>
    %c0_6 = arith.constant 0 : index
    %c0_7 = arith.constant 0 : index
    %10 = vector.load %arg4[%c0_6, %c0_7] : memref<36x144xbf16, #tpu.memory_space<vmem>>, vector<36x144xbf16>
    %cst_8 = arith.constant dense<0.000000e+00> : vector<16x144xf32>
    %11 = tpu.matmul %9, %10, %cst_8 {dimension_numbers = #tpu.dot_dimension_numbers<[1], [0], [0], [1], [0, 0, 1, 1], [], []>} : vector<16x36xbf16>, vector<36x144xbf16>, vector<16x144xf32> -> vector<16x144xf32>
    %c0_9 = arith.constant 0 : index
    %c0_10 = arith.constant 0 : index
    %12 = vector.load %arg5[%c0_9, %c0_10] : memref<1x144xf32, #tpu.memory_space<vmem>>, vector<1x144xf32>
    %13 = vector.broadcast %12 : vector<1x144xf32> to vector<16x144xf32>
    %14 = arith.addf %11, %13 : vector<16x144xf32>
    %cst_11 = arith.constant 2.000000e-01 : f32
    %15 = vector.broadcast %cst_11 : f32 to vector<16x144xf32>
    %16 = arith.mulf %15, %14 : vector<16x144xf32>
    %17 = arith.maximumf %14, %16 : vector<16x144xf32>
    %18 = arith.truncf %17 : vector<16x144xf32> to vector<16x144xbf16>
    %c0_12 = arith.constant 0 : index
    %c0_13 = arith.constant 0 : index
    %19 = vector.load %arg6[%c0_12, %c0_13] : memref<144x1296xbf16, #tpu.memory_space<vmem>>, vector<144x1296xbf16>
    %cst_14 = arith.constant dense<0.000000e+00> : vector<16x1296xf32>
    %20 = tpu.matmul %18, %19, %cst_14 {dimension_numbers = #tpu.dot_dimension_numbers<[1], [0], [0], [1], [0, 0, 1, 1], [], []>} : vector<16x144xbf16>, vector<144x1296xbf16>, vector<16x1296xf32> -> vector<16x1296xf32>
    %c0_15 = arith.constant 0 : index
    %c0_16 = arith.constant 0 : index
    %21 = vector.load %arg7[%c0_15, %c0_16] : memref<1x1296xf32, #tpu.memory_space<vmem>>, vector<1x1296xf32>
    %22 = vector.broadcast %21 : vector<1x1296xf32> to vector<16x1296xf32>
    %23 = arith.addf %20, %22 : vector<16x1296xf32>
    %24 = arith.truncf %23 : vector<16x1296xf32> to vector<16x1296xbf16>
    %c0_17 = arith.constant 0 : index
    %c0_18 = arith.constant 0 : index
    %25 = vector.load %arg8[%c0_17, %c0_18] : memref<16x1296xbf16, #tpu.memory_space<vmem>>, vector<16x1296xbf16>
    tpu.vector_store %arg8[%c0_17, %c0_18], %24 {strides = array<i32>} : memref<16x1296xbf16, #tpu.memory_space<vmem>>, vector<16x1296xbf16>,
    return
  }
  func.func @transform_0(%arg0: i32) -> (i32, i32) {
    %c0_i32 = arith.constant 0 : i32
    %c0_i32_0 = arith.constant 0 : i32
    return %arg0, %c0_i32 : i32, i32
  }
  func.func @transform_1(%arg0: i32) -> (i32, i32) {
    %c0_i32 = arith.constant 0 : i32
    %c0_i32_0 = arith.constant 0 : i32
    %c0_i32_1 = arith.constant 0 : i32
    return %c0_i32, %c0_i32_0 : i32, i32
  }
  func.func @transform_2(%arg0: i32) -> (i32, i32) {
    %c0_i32 = arith.constant 0 : i32
    %c0_i32_0 = arith.constant 0 : i32
    %c0_i32_1 = arith.constant 0 : i32
    return %c0_i32, %c0_i32_0 : i32, i32
  }
  func.func @transform_3(%arg0: i32) -> (i32, i32) {
    %c0_i32 = arith.constant 0 : i32
    %c0_i32_0 = arith.constant 0 : i32
    %c0_i32_1 = arith.constant 0 : i32
    return %c0_i32, %c0_i32_0 : i32, i32
  }
  func.func @transform_4(%arg0: i32) -> (i32, i32) {
    %c0_i32 = arith.constant 0 : i32
    %c0_i32_0 = arith.constant 0 : i32
    %c0_i32_1 = arith.constant 0 : i32
    return %c0_i32, %c0_i32_0 : i32, i32
  }
  func.func @transform_5(%arg0: i32) -> (i32, i32) {
    %c0_i32 = arith.constant 0 : i32
    %c0_i32_0 = arith.constant 0 : i32
    %c0_i32_1 = arith.constant 0 : i32
    return %c0_i32, %c0_i32_0 : i32, i32
  }
  func.func @transform_6(%arg0: i32) -> (i32, i32) {
    %c0_i32 = arith.constant 0 : i32
    %c0_i32_0 = arith.constant 0 : i32
    %c0_i32_1 = arith.constant 0 : i32
    return %c0_i32, %c0_i32_0 : i32, i32
  }
  func.func @transform_7(%arg0: i32) -> (i32, i32) {
    %c0_i32 = arith.constant 0 : i32
    %c0_i32_0 = arith.constant 0 : i32
    return %arg0, %c0_i32 : i32, i32
  }
}

</mosaic_0001>

<bundles_post_ra>
// kernel: generator_forward.1
= control target key start
LH: loop header
LB: loop body
LE: loop exit
PB: predicated region body
PF: predicated region fallthrough
CT: control target
= control target key end

     0   :  { %12 = vsyncpa [#allocation3], 0  ;;  %s1838_s0 = inlined_call_operand.vmem [shape: bf16[16,16], index: 0, kind: input, shape index: {}]   ;;  %s1839_s1 = inlined_call_operand.vmem [shape: bf16[16,36], index: 1, kind: input, shape index: {}]   ;;  %s1840_s2 = inlined_call_operand.hbm [shape: f32[1,36], index: 2, kind: input, shape index: {}]   ;;  %s1841_s3 = inlined_call_operand.hbm [shape: bf16[36,144], index: 3, kind: input, shape index: {}]   ;;  %s1842_s4 = inlined_call_operand.vmem [shape: f32[1,144], index: 4, kind: input, shape index: {}]   ;;  %s1843_s5 = inlined_call_operand.hbm [shape: bf16[144,1296], index: 5, kind: input, shape index: {}]   ;;  %s1844_s6 = inlined_call_operand.vmem [shape: f32[1,1296], index: 6, kind: input, shape index: {}]   ;;  %s1845_s7 = inlined_call_operand.vmem [shape: bf16[16,1296], index: 7, kind: output, shape index: {}]  }
   0x1   :  { %13 = vsyncpa [#allocation5], 0  ;;  %s1644_s24 = smov [#allocation4]   ;;  %s1574_s28 = scalar_lea.hbm %s1841_s3, 640 }
   0x2   :  { %s33_s25 = sshll.u32 %s1644_s24, 4  ;;  %p1575_p0 = scmp.ne.s32.totalorder %s1841_s3, %s1574_s28  ;;  %s34_s25 = int_to_ptr.vmem [resolvable:$true] %s33_s25 }
   0x3   :  { %p1578_p1 = scmp.lt.u32.totalorder %s1574_s28, %s1841_s3 }
   0x5   :  { %p1580_p2 = pnand %p1578_p1, %p1575_p0 }
   0x7   :  { %1583 = shalt.err (!%p1580_p2)
}
   0x8   :  { %s1584_s10 = scalar_lea.vmem %s34_s25, 640  ;;  %p1589_p4 = scmp.lt.s32.totalorder %s34_s25, %s34_s25 }
   0x9   :  { %p1585_p3 = scmp.ne.s32.totalorder %s34_s25, %s1584_s10  ;;  %p1590_p5 = scmp.lt.s32.totalorder %s1584_s10, %s1584_s10 }
   0xb   :  { %p1591_p6 = por %p1590_p5, %p1589_p4 }
   0xd   :  { %p1592_p7 = pnand %p1591_p6, %p1585_p3 }
   0xf   :  { %1595 = shalt.err (!%p1592_p7)
}
  0x10   :  { %s1645_s11 = smov 128   ;;  %s1646_s12 = smov 8  }
  0x11   :  { %39 = dma.hbm_to_vmem [thread:$0]  %s1841_s3, 640, %s34_s25, [#allocation5], %s1645_s11, %s1645_s11, %s1646_s12  }
  0x12   :  { %s1647_s15 = smov [#allocation2]   ;;  %s1648_s17 = smov [#allocation6]  }
  0x13   :  { %s24_s16 = sshll.u32 %s1647_s15, 4  ;;  %s47_s18 = sshll.u32 %s1648_s17, 4  ;;  %s25_s16 = int_to_ptr.vmem [resolvable:$true] %s24_s16  ;;  %s48_s18 = int_to_ptr.vmem [resolvable:$true] %s47_s18 }
  0x14   :  { %s1596_s21 = scalar_lea.hbm %s1840_s2, 16 }
  0x15   :  { %p1597_p8 = scmp.ne.s32.totalorder %s1840_s2, %s1596_s21  ;;  %p1600_p9 = scmp.lt.u32.totalorder %s1596_s21, %s1840_s2 }
  0x17   :  { %p1602_p10 = pnand %p1600_p9, %p1597_p8 }
  0x19   :  { %1605 = shalt.err (!%p1602_p10)
}
  0x1a   :  { %s1606_s3 = scalar_lea.vmem %s25_s16, 16  ;;  %s1610_s25 = scalar_lea.vmem %s25_s16, 32 }
  0x1b   :  { %p1607_p11 = scmp.ne.s32.totalorder %s25_s16, %s1606_s3  ;;  %p1611_p12 = scmp.lt.s32.totalorder %s25_s16, %s25_s16 }
  0x1c   :  { %p1612_p13 = scmp.lt.s32.totalorder %s1610_s25, %s1606_s3 }
  0x1e   :  { %p1613_p0 = por %p1612_p13, %p1611_p12 }
  0x20   :  { %p1614_p1 = pnand %p1613_p0, %p1607_p11 }
  0x22   :  { %1617 = shalt.err (!%p1614_p1)
}
  0x23   :  { %27 = dma.hbm_to_vmem [thread:$0]  %s1840_s2, 16, %s25_s16, [#allocation3]  }
  0x24   :  { %s1618_s8 = scalar_lea.hbm %s1843_s5, 12672 }
  0x25   :  { %p1619_p2 = scmp.ne.s32.totalorder %s1843_s5, %s1618_s8  ;;  %p1622_p3 = scmp.lt.u32.totalorder %s1618_s8, %s1843_s5 }
  0x27   :  { %p1624_p4 = pnand %p1622_p3, %p1619_p2 }
  0x29   :  { %1627 = shalt.err (!%p1624_p4)
}
  0x2a   :  { %s1628_s13 = scalar_lea.vmem %s48_s18, 12672  ;;  %p1633_p6 = scmp.lt.s32.totalorder %s48_s18, %s48_s18 }
  0x2b   :  { %p1629_p5 = scmp.ne.s32.totalorder %s48_s18, %s1628_s13  ;;  %p1634_p7 = scmp.lt.s32.totalorder %s1628_s13, %s1628_s13 }
  0x2d   :  { %p1635_p8 = por %p1634_p7, %p1633_p6 }
  0x2f   :  { %p1636_p9 = pnand %p1635_p8, %p1629_p5 }
  0x31   :  { %1639 = shalt.err (!%p1636_p9)
}
  0x32   :  { %s1649_s2 = smov 704   ;;  %s1650_s14 = smov 44  }
  0x33   :  { %53 = dma.hbm_to_vmem [thread:$0]  %s1843_s5, 12672, %s48_s18, [#allocation5], %s1649_s2, %s1649_s2, %s1650_s14  }
  0x34   :  { %1640 = dma.done.wait [#allocation3], 16  }
  0x35   :  { %1641 = vsyncadd [#allocation3], 4294967280 }
  0x36   :  { %1642 = dma.done.wait [#allocation5], 13312  }
  0x37   :  { %1643 = vsyncadd [#allocation5], 4294953984  ;;  %v1651_v0 = vmov 0.0   ;;  %vm1652_vm0 = vmmov 0   ;;  %v1420_v1 = vld [vmem:[%s1839_s1] sm:$0xff]   ;;  %vm88_vm1 = vcmask 130048   ;;  %v145_v62 = vlaneseq }
  0x38   :  { %1404 = vmatprep.subr.bf16.mxu0 %v1651_v0  ;;  %1406 = vmatprep.mubr.msk.bf16.mxu0 %vm1652_vm0, %v1651_v0  ;;  %v1421_v2 = vld [vmem:[%s1838_s0] sm:$0xff]   ;;  %v1425_v5 = vld [vmem:[#allocation4 + $0x14] ss:$8 sps:$4 sm:$0xff]   ;;  %v1427_v6 = vld [vmem:[#allocation4 + $0x10] ss:$8 sps:$4 sm:$0xff]   ;;  %vm184_vm2 = vcmask 1041408  }
  0x39   :  { %1405 = vmatpush3.bf16.msra.mxu0 %v1420_v1  ;;  %v1422_v3 = vld [vmem:[#allocation4 + $0x4] ss:$8 sps:$4 sm:$0xff]   ;;  %v1424_v4 = vld [vmem:[#allocation4] ss:$8 sps:$4 sm:$0xff]   ;;  %v1653_v11 = vmov 0   ;;  %vm180_vm3 = vcmask 293888  }
  0x3a   :  { %191 = vmatprep.subr.bf16.mxu1 %v1422_v3  ;;  %v142_v7 = vld [vmem:[#allocation4 + $0x20] sm:$0x33]  ;;  %223 = vmatprep.mubr.bf16.mxu1 %v1653_v11  ;;  %v1430_v12 = vld [vmem:[#allocation6] ss:$44 sps:$4 sm:$0xff]   ;;  %v1432_v13 = vld [vmem:[#allocation6 + $0x4] ss:$44 sps:$4 sm:$0xff]  }
  0x3b   :  { %192 = vmatpush1.bf16.msra.mxu1 %v1424_v4  ;;  %v1270_v8 = vcombine.high %v142_v7, %v142_v7  ;;  %v1269_v9 = vcombine.low %v142_v7, %v142_v7  ;;  %v1435_v14 = vld [vmem:[#allocation6 + $0xc] ss:$44 sps:$4 sm:$0xff]   ;;  %v1438_v15 = vld [vmem:[#allocation6 + $0x5c] ss:$44 sps:$4 sm:$0xff]   ;;  %918 = vmatprep.subr.bf16.mxu0 %v1432_v13  ;;  %v1444_v17 = vld [vmem:[#allocation6 + $0xb4] ss:$44 sps:$4 sm:$0xff]  }
  0x3c   :  { %1407 = vmatmul.mubr.msk.bf16.vlgmr.msra.gmra.mrb[0].mxu0 %vm88_vm1, %v1421_v2  ;;  %193 = vmatprep.subr.bf16.mxu1 %v1425_v5  ;;  %v1436_v16 = vld [vmem:[#allocation6 + $0x58] ss:$44 sps:$4 sm:$0xff]   ;;  %v1442_v18 = vld [vmem:[#allocation6 + $0xb0] ss:$44 sps:$4 sm:$0xff]   ;;  %v1448_v20 = vld [vmem:[#allocation6 + $0x108] ss:$44 sps:$4 sm:$0xff]  }
  0x3d   :  { %v186_v10 = vsel %vm184_vm2, %v1269_v9, 0  ;;  %919 = vmatpush1.bf16.msra.mxu0 %v1430_v12  ;;  %v1450_v19 = vld [vmem:[#allocation6 + $0x10c] ss:$44 sps:$4 sm:$0xff]   ;;  %v1456_v21 = vld [vmem:[#allocation6 + $0x164] ss:$44 sps:$4 sm:$0xff]   ;;  %v1738_v63 = vshrl.u32 %v145_v62, 7 }
  0x3e   :  { %920 = vmatprep.subr.bf16.mxu0 %v1438_v15  ;;  %v1454_v22 = vld [vmem:[#allocation6 + $0x160] ss:$44 sps:$4 sm:$0xff]   ;;  %v1462_v23 = vld [vmem:[#allocation6 + $0x1bc] ss:$44 sps:$4 sm:$0xff]   ;;  %v1460_v24 = vld [vmem:[#allocation6 + $0x1b8] ss:$44 sps:$4 sm:$0xff]  }
  0x3f   :  { %194 = vmatpush1.bf16.msra.mxu1 %v1427_v6  ;;  %v1261_v25 = vld [vmem:[#allocation2] ss:$0 sm:$0xff]  ;;  %v1441_v38 = vld [vmem:[#allocation6 + $0x64] ss:$44 sps:$4 sm:$0xff]   ;;  %v1439_v39 = vld [vmem:[#allocation6 + $0x60] ss:$44 sps:$4 sm:$0xff]  }
  0x40   :  { %1271 = vmatprep.subr.msk.bf16.mxu1 %vm184_vm2, %v1270_v8  ;;  %v1433_v36 = vld [vmem:[#allocation6 + $0x8] ss:$44 sps:$4 sm:$0xff]   ;;  %v1445_v41 = vld [vmem:[#allocation6 + $0xb8] ss:$44 sps:$4 sm:$0xff]   ;;  %v1451_v43 = vld [vmem:[#allocation6 + $0x110] ss:$44 sps:$4 sm:$0xff]  }
  0x41   :  { %921 = vmatpush1.bf16.msra.mxu0 %v1436_v16  ;;  %v1447_v40 = vld [vmem:[#allocation6 + $0xbc] ss:$44 sps:$4 sm:$0xff]   ;;  %v1453_v42 = vld [vmem:[#allocation6 + $0x114] ss:$44 sps:$4 sm:$0xff]   ;;  %v1459_v44 = vld [vmem:[#allocation6 + $0x16c] ss:$44 sps:$4 sm:$0xff]  }
  0x42   :  { %922 = vmatprep.subr.bf16.mxu0 %v1444_v17  ;;  %v1457_v45 = vld [vmem:[#allocation6 + $0x168] ss:$44 sps:$4 sm:$0xff]   ;;  %v1465_v46 = vld [vmem:[#allocation6 + $0x1c4] ss:$44 sps:$4 sm:$0xff]   ;;  %v1463_v47 = vld [vmem:[#allocation6 + $0x1c0] ss:$44 sps:$4 sm:$0xff]  }
  0x43   :  { %196 = vmatpush1.bf16.msra.mxu1 %v186_v10  ;;  %v1468_v48 = vld [vmem:[#allocation6 + $0x214] ss:$44 sps:$4 sm:$0xff]   ;;  %v1471_v49 = vld [vmem:[#allocation6 + $0x21c] ss:$44 sps:$4 sm:$0xff]   ;;  %v1469_v51 = vld [vmem:[#allocation6 + $0x218] ss:$44 sps:$4 sm:$0xff]  }
  0x44   :  { %961 = vmatprep.subr.bf16.mxu1 %v1435_v14  ;;  %v1466_v50 = vld [vmem:[#allocation6 + $0x210] ss:$44 sps:$4 sm:$0xff]   ;;  %v1474_v52 = vld [vmem:[#allocation6 + $0x26c] ss:$44 sps:$4 sm:$0xff]   ;;  %v1477_v53 = vld [vmem:[#allocation6 + $0x274] ss:$44 sps:$4 sm:$0xff]  }
  0x45   :  { %923 = vmatpush1.bf16.msra.mxu0 %v1442_v18  ;;  %v1472_v54 = vld [vmem:[#allocation6 + $0x268] ss:$44 sps:$4 sm:$0xff]   ;;  %v1475_v55 = vld [vmem:[#allocation6 + $0x270] ss:$44 sps:$4 sm:$0xff]   ;;  %v1483_v57 = vld [vmem:[#allocation6 + $0x2cc] ss:$44 sps:$4 sm:$0xff]  }
  0x46   :  { %924 = vmatprep.subr.bf16.mxu0 %v1450_v19  ;;  %v1480_v56 = vld [vmem:[#allocation6 + $0x2c4] ss:$44 sps:$4 sm:$0xff]   ;;  %v1478_v58 = vld [vmem:[#allocation6 + $0x2c0] ss:$44 sps:$4 sm:$0xff]   ;;  %v1481_v59 = vld [vmem:[#allocation6 + $0x2c8] ss:$44 sps:$4 sm:$0xff]  }
  0x47   :  { %v1486_v60 = vld [vmem:[#allocation6 + $0x14] ss:$44 sps:$4 sm:$0xff]   ;;  %v1489_v61 = vld [vmem:[#allocation6 + $0x1c] ss:$44 sps:$4 sm:$0xff]   ;;  %v1741_v0 = vsub.s32 0, %v1738_v63  ;;  %v1747_v2 = vsub.s32 1, %v1738_v63 }
  0x48   :  { %v143_v1 = vld [vmem:[%s1842_s4] sm:$0x3]  ;;  %v1542_v62 = vld [vmem:[#allocation6 + $0x78] ss:$44 sps:$4 sm:$0xff]   ;;  %vm1247_vm4 = vcmask 125952  }
  0x49   :  { %925 = vmatpush1.bf16.msra.mxu0 %v1448_v20  ;;  %v148_v3 = vrot.slane %v143_v1, %v1741_v0  ;;  %v152_v4 = vrot.slane %v143_v1, %v1747_v2  ;;  %v1545_v1 = vld [vmem:[#allocation6 + $0x80] ss:$44 sps:$4 sm:$0xff]  }
  0x4a   :  { %926 = vmatprep.subr.bf16.mxu0 %v1456_v21 }
  0x4d   :  { %927 = vmatpush1.bf16.msra.mxu0 %v1454_v22 }
  0x4e   :  { %928 = vmatprep.subr.bf16.mxu0 %v1462_v23 }
  0x51   :  { %929 = vmatpush1.bf16.msra.mxu0 %v1460_v24  ;;  %v1484_v24 = vld [vmem:[#allocation6 + $0x10] ss:$44 sps:$4 sm:$0xff]  }
  0x52   :  { %930 = vmatprep.subr.bf16.mxu0 %v1468_v48  ;;  %v1520_v48 = vld [vmem:[#allocation6 + $0x220] ss:$44 sps:$4 sm:$0xff]  }
  0x55   :  { %931 = vmatpush1.bf16.msra.mxu0 %v1466_v50  ;;  %v1528_v50 = vld [vmem:[#allocation6 + $0x27c] ss:$44 sps:$4 sm:$0xff]  }
  0x56   :  { %932 = vmatprep.subr.bf16.mxu0 %v1474_v52  ;;  %v1526_v52 = vld [vmem:[#allocation6 + $0x278] ss:$44 sps:$4 sm:$0xff]  }
  0x59   :  { %933 = vmatpush1.bf16.msra.mxu0 %v1472_v54  ;;  %v1534_v54 = vld [vmem:[#allocation6 + $0x2d4] ss:$44 sps:$4 sm:$0xff]  }
  0x5a   :  { %934 = vmatprep.subr.bf16.mxu0 %v1480_v56  ;;  %v1532_v56 = vld [vmem:[#allocation6 + $0x2d0] ss:$44 sps:$4 sm:$0xff]  }
  0x5d   :  { %935 = vmatpush1.bf16.msra.mxu0 %v1478_v58  ;;  %v1540_v58 = vld [vmem:[#allocation6 + $0x24] ss:$44 sps:$4 sm:$0xff]  }
  0x5e   :  { %1004 = vmatprep.subr.bf16.mxu0 %v1486_v60  ;;  %v1541_v60 = vld [vmem:[#allocation6 + $0x28] ss:$44 sps:$4 sm:$0xff]  }
 0x10f   :  { %v126_v26 = vpop.f32.mrb[0].mxu0 }
 0x110   :  { %v127_v27 = vadd.f32 %v1261_v25, %v126_v26  ;;  %v1408_v28 = vpop.f32.mrb[1].mxu0  ;;  %v1492_v26 = vld [vmem:[#allocation6 + $0x6c] ss:$44 sps:$4 sm:$0xff]  }
 0x111   :  { %v129_v29 = vpop.f32.mrb[2].mxu0  ;;  %v1490_v28 = vld [vmem:[#allocation6 + $0x68] ss:$44 sps:$4 sm:$0xff]  }
 0x112   :  { %v133_v30 = vmul.f32 0.2, %v127_v27  ;;  %v130_v31 = vadd.f32 %v1261_v25, %v129_v29  ;;  %v1409_v32 = vpop.f32.mrb[3].mxu0  ;;  %v1487_v25 = vld [vmem:[#allocation6 + $0x18] ss:$44 sps:$4 sm:$0xff]  }
 0x113   :  { %v1493_v29 = vld [vmem:[#allocation6 + $0x70] ss:$44 sps:$4 sm:$0xff]   ;;  %v1496_v32 = vld [vmem:[#allocation6 + $0xc0] ss:$44 sps:$4 sm:$0xff]  }
 0x114   :  { %v134_v33 = vmul.f32 0.2, %v130_v31  ;;  %v135_v34 = vmax.f32 %v127_v27, %v133_v30  ;;  %v1495_v27 = vld [vmem:[#allocation6 + $0x74] ss:$44 sps:$4 sm:$0xff]   ;;  %v1498_v30 = vld [vmem:[#allocation6 + $0xc4] ss:$44 sps:$4 sm:$0xff]  }
 0x116   :  { %v136_v35 = vmax.f32 %v130_v31, %v134_v33  ;;  %v1501_v31 = vld [vmem:[#allocation6 + $0xcc] ss:$44 sps:$4 sm:$0xff]   ;;  %v1499_v33 = vld [vmem:[#allocation6 + $0xc8] ss:$44 sps:$4 sm:$0xff]  }
 0x118   :  { %v137_v37 = vpack.c.bf16 %v136_v35, %v135_v34  ;;  %v1504_v34 = vld [vmem:[#allocation6 + $0x11c] ss:$44 sps:$4 sm:$0xff]   ;;  %v1507_v35 = vld [vmem:[#allocation6 + $0x124] ss:$44 sps:$4 sm:$0xff]  }
 0x11a   :  { %1272 = vmatmul.mubr.msk.bf16.vlgmr.msra.gmra.mrb[0].mxu1 %vm180_vm3, %v137_v37  ;;  %v1505_v37 = vld [vmem:[#allocation6 + $0x120] ss:$44 sps:$4 sm:$0xff]  }
 0x11b   :  { %962 = vmatpush1.bf16.msra.mxu1 %v1433_v36  ;;  %v1502_v36 = vld [vmem:[#allocation6 + $0x118] ss:$44 sps:$4 sm:$0xff]  }
 0x11c   :  { %963 = vmatprep.subr.bf16.mxu1 %v1441_v38  ;;  %v1510_v38 = vld [vmem:[#allocation6 + $0x174] ss:$44 sps:$4 sm:$0xff]  }
 0x11f   :  { %964 = vmatpush1.bf16.msra.mxu1 %v1439_v39  ;;  %v1513_v39 = vld [vmem:[#allocation6 + $0x17c] ss:$44 sps:$4 sm:$0xff]  }
 0x120   :  { %965 = vmatprep.subr.bf16.mxu1 %v1447_v40  ;;  %v1508_v40 = vld [vmem:[#allocation6 + $0x170] ss:$44 sps:$4 sm:$0xff]  }
 0x123   :  { %966 = vmatpush1.bf16.msra.mxu1 %v1445_v41  ;;  %v1511_v41 = vld [vmem:[#allocation6 + $0x178] ss:$44 sps:$4 sm:$0xff]  }
 0x124   :  { %967 = vmatprep.subr.bf16.mxu1 %v1453_v42  ;;  %v1516_v42 = vld [vmem:[#allocation6 + $0x1cc] ss:$44 sps:$4 sm:$0xff]  }
 0x127   :  { %968 = vmatpush1.bf16.msra.mxu1 %v1451_v43  ;;  %v1519_v43 = vld [vmem:[#allocation6 + $0x1d4] ss:$44 sps:$4 sm:$0xff]  }
 0x128   :  { %969 = vmatprep.subr.bf16.mxu1 %v1459_v44  ;;  %v1514_v44 = vld [vmem:[#allocation6 + $0x1c8] ss:$44 sps:$4 sm:$0xff]  }
 0x12b   :  { %970 = vmatpush1.bf16.msra.mxu1 %v1457_v45  ;;  %v1517_v45 = vld [vmem:[#allocation6 + $0x1d0] ss:$44 sps:$4 sm:$0xff]  }
 0x12c   :  { %971 = vmatprep.subr.bf16.mxu1 %v1465_v46  ;;  %v1522_v46 = vld [vmem:[#allocation6 + $0x224] ss:$44 sps:$4 sm:$0xff]  }
 0x12f   :  { %972 = vmatpush1.bf16.msra.mxu1 %v1463_v47  ;;  %v1525_v47 = vld [vmem:[#allocation6 + $0x22c] ss:$44 sps:$4 sm:$0xff]  }
 0x130   :  { %973 = vmatprep.subr.bf16.mxu1 %v1471_v49  ;;  %v1523_v49 = vld [vmem:[#allocation6 + $0x228] ss:$44 sps:$4 sm:$0xff]  }
 0x133   :  { %974 = vmatpush1.bf16.msra.mxu1 %v1469_v51  ;;  %v1531_v51 = vld [vmem:[#allocation6 + $0x284] ss:$44 sps:$4 sm:$0xff]  }
 0x134   :  { %975 = vmatprep.subr.bf16.mxu1 %v1477_v53  ;;  %v1529_v53 = vld [vmem:[#allocation6 + $0x280] ss:$44 sps:$4 sm:$0xff]  }
 0x137   :  { %976 = vmatpush1.bf16.msra.mxu1 %v1475_v55  ;;  %v1537_v55 = vld [vmem:[#allocation6 + $0x2dc] ss:$44 sps:$4 sm:$0xff]  }
 0x138   :  { %977 = vmatprep.subr.bf16.mxu1 %v1483_v57  ;;  %v1535_v57 = vld [vmem:[#allocation6 + $0x2d8] ss:$44 sps:$4 sm:$0xff]  }
 0x13b   :  { %978 = vmatpush1.bf16.msra.mxu1 %v1481_v59  ;;  %v1538_v59 = vld [vmem:[#allocation6 + $0x20] ss:$44 sps:$4 sm:$0xff]  }
 0x13c   :  { %1047 = vmatprep.subr.bf16.mxu1 %v1489_v61  ;;  %v1544_v61 = vld [vmem:[#allocation6 + $0x7c] ss:$44 sps:$4 sm:$0xff]  }
 0x1ed   :  { %v225_v5 = vpop.f32.mrb[0].mxu1 }
 0x1ee   :  { %v226_v6 = vadd.f32 %v225_v5, %v148_v3  ;;  %v227_v7 = vpop.f32.mrb[1].mxu1  ;;  %v1549_v5 = vld [vmem:[#allocation6 + $0xd8] ss:$44 sps:$4 sm:$0xff]  }
 0x1ef   :  { %v228_v8 = vadd.f32 %v227_v7, %v152_v4  ;;  %v229_v9 = vpop.f32.mrb[2].mxu1  ;;  %v1550_v7 = vld [vmem:[#allocation6 + $0x128] ss:$44 sps:$4 sm:$0xff]  }
 0x1f0   :  { %v234_v10 = vmul.f32 0.2, %v226_v6  ;;  %v230_v12 = vadd.f32 %v229_v9, %v148_v3  ;;  %v231_v13 = vpop.f32.mrb[3].mxu1  ;;  %v1548_v3 = vld [vmem:[#allocation6 + $0xd4] ss:$44 sps:$4 sm:$0xff]  }
 0x1f1   :  { %v235_v14 = vmul.f32 0.2, %v228_v8  ;;  %v232_v15 = vadd.f32 %v231_v13, %v152_v4  ;;  %v1546_v4 = vld [vmem:[#allocation6 + $0xd0] ss:$44 sps:$4 sm:$0xff]  }
 0x1f2   :  { %v236_v16 = vmul.f32 0.2, %v230_v12  ;;  %v238_v18 = vmax.f32 %v226_v6, %v234_v10  ;;  %v1552_v6 = vld [vmem:[#allocation6 + $0x12c] ss:$44 sps:$4 sm:$0xff]   ;;  %v1556_v9 = vld [vmem:[#allocation6 + $0x184] ss:$44 sps:$4 sm:$0xff]  }
 0x1f3   :  { %v237_v17 = vmul.f32 0.2, %v232_v15  ;;  %v239_v20 = vmax.f32 %v228_v8, %v235_v14  ;;  %v1553_v8 = vld [vmem:[#allocation6 + $0x130] ss:$44 sps:$4 sm:$0xff]   ;;  %v1554_v10 = vld [vmem:[#allocation6 + $0x180] ss:$44 sps:$4 sm:$0xff]  }
 0x1f4   :  { %v240_v19 = vmax.f32 %v230_v12, %v236_v16  ;;  %v1557_v12 = vld [vmem:[#allocation6 + $0x188] ss:$44 sps:$4 sm:$0xff]   ;;  %v1558_v14 = vld [vmem:[#allocation6 + $0x1d8] ss:$44 sps:$4 sm:$0xff]  }
 0x1f5   :  { %v241_v21 = vmax.f32 %v232_v15, %v237_v17  ;;  %v1560_v13 = vld [vmem:[#allocation6 + $0x1dc] ss:$44 sps:$4 sm:$0xff]   ;;  %v1561_v15 = vld [vmem:[#allocation6 + $0x1e0] ss:$44 sps:$4 sm:$0xff]  }
 0x1f6   :  { %v1751_v22 = vpack.c.bf16 %v240_v19, %v238_v18  ;;  %v1564_v16 = vld [vmem:[#allocation6 + $0x234] ss:$44 sps:$4 sm:$0xff]   ;;  %v1562_v17 = vld [vmem:[#allocation6 + $0x230] ss:$44 sps:$4 sm:$0xff]   ;;  %v1565_v18 = vld [vmem:[#allocation6 + $0x238] ss:$44 sps:$4 sm:$0xff]  }
 0x1f7   :  { %v1753_v23 = vpack.c.bf16 %v241_v21, %v239_v20  ;;  %v1568_v19 = vld [vmem:[#allocation6 + $0x28c] ss:$44 sps:$4 sm:$0xff]   ;;  %v1566_v20 = vld [vmem:[#allocation6 + $0x288] ss:$44 sps:$4 sm:$0xff]   ;;  %v1569_v21 = vld [vmem:[#allocation6 + $0x290] ss:$44 sps:$4 sm:$0xff]  }
 0x1f9   :  { %1372 = vmatprep.mubr.msk.bf16.mxu0 %vm88_vm1, %v1753_v23  ;;  %1373 = vmatprep.mubr.msk.bf16.mxu1 %vm88_vm1, %v1753_v23 }
 0x1fa   :  { %951 = vmatmul.mubr.bf16.vlgmr.msra.gmra.mrb[4].mxu0 %v1751_v22  ;;  %994 = vmatmul.mubr.bf16.vlgmr.msra.gmra.mrb[4].mxu1 %v1751_v22 }
 0x1fb   :  { %1005 = vmatpush1.bf16.msra.mxu0 %v1484_v24  ;;  %1048 = vmatpush1.bf16.msra.mxu1 %v1487_v25  ;;  %v1570_v24 = vld [vmem:[#allocation6 + $0x2e0] ss:$44 sps:$4 sm:$0xff]   ;;  %v1573_v25 = vld [vmem:[#allocation6 + $0x2e8] ss:$44 sps:$4 sm:$0xff]  }
 0x1fc   :  { %1374 = vmatprep.mubr.msk.bf16.mxu0 %vm88_vm1, %v1753_v23  ;;  %1375 = vmatprep.mubr.msk.bf16.mxu1 %vm88_vm1, %v1753_v23 }
 0x1fd   :  { %1006 = vmatprep.subr.bf16.mxu0 %v1492_v26  ;;  %1049 = vmatprep.subr.bf16.mxu1 %v1495_v27  ;;  %v366_v26 = vsub.s32 2, %v1738_v63  ;;  %v352_v27 = vld [vmem:[%s1844_s6] sm:$0xff] }
 0x1ff   :  { %1007 = vmatpush1.bf16.msra.mxu0 %v1490_v28  ;;  %1050 = vmatpush1.bf16.msra.mxu1 %v1493_v29  ;;  %v370_v28 = vsub.s32 3, %v1738_v63  ;;  %v359_v29 = vrot.slane %v352_v27, %v1741_v0 }
 0x200   :  { %1008 = vmatprep.subr.bf16.mxu0 %v1498_v30  ;;  %1051 = vmatprep.subr.bf16.mxu1 %v1501_v31  ;;  %v367_v30 = vrot.slane %v352_v27, %v366_v26 }
 0x201   :  { %v371_v31 = vrot.slane %v352_v27, %v370_v28 }
 0x203   :  { %1009 = vmatpush1.bf16.msra.mxu0 %v1496_v32  ;;  %1052 = vmatpush1.bf16.msra.mxu1 %v1499_v33 }
 0x204   :  { %1010 = vmatprep.subr.bf16.mxu0 %v1504_v34  ;;  %1053 = vmatprep.subr.bf16.mxu1 %v1507_v35 }
 0x207   :  { %1011 = vmatpush1.bf16.msra.mxu0 %v1502_v36  ;;  %1054 = vmatpush1.bf16.msra.mxu1 %v1505_v37 }
 0x208   :  { %1012 = vmatprep.subr.bf16.mxu0 %v1510_v38  ;;  %1055 = vmatprep.subr.bf16.mxu1 %v1513_v39 }
 0x20b   :  { %1013 = vmatpush1.bf16.msra.mxu0 %v1508_v40  ;;  %1056 = vmatpush1.bf16.msra.mxu1 %v1511_v41 }
 0x20c   :  { %1014 = vmatprep.subr.bf16.mxu0 %v1516_v42  ;;  %1057 = vmatprep.subr.bf16.mxu1 %v1519_v43 }
 0x20f   :  { %1015 = vmatpush1.bf16.msra.mxu0 %v1514_v44  ;;  %1058 = vmatpush1.bf16.msra.mxu1 %v1517_v45 }
 0x210   :  { %1016 = vmatprep.subr.bf16.mxu0 %v1522_v46  ;;  %1059 = vmatprep.subr.bf16.mxu1 %v1525_v47 }
 0x213   :  { %1017 = vmatpush1.bf16.msra.mxu0 %v1520_v48  ;;  %1060 = vmatpush1.bf16.msra.mxu1 %v1523_v49 }
 0x214   :  { %1018 = vmatprep.subr.bf16.mxu0 %v1528_v50  ;;  %1061 = vmatprep.subr.bf16.mxu1 %v1531_v51  ;;  %v374_v51 = vsub.s32 4, %v1738_v63 }
 0x217   :  { %1019 = vmatpush1.bf16.msra.mxu0 %v1526_v52  ;;  %1062 = vmatpush1.bf16.msra.mxu1 %v1529_v53  ;;  %v382_v52 = vsub.s32 6, %v1738_v63  ;;  %v378_v53 = vsub.s32 5, %v1738_v63 }
 0x218   :  { %1020 = vmatprep.subr.bf16.mxu0 %v1534_v54  ;;  %1063 = vmatprep.subr.bf16.mxu1 %v1537_v55  ;;  %v386_v54 = vsub.s32 7, %v1738_v63  ;;  %v375_v55 = vrot.slane %v352_v27, %v374_v51 }
 0x21b   :  { %1021 = vmatpush1.bf16.msra.mxu0 %v1532_v56  ;;  %1064 = vmatpush1.bf16.msra.mxu1 %v1535_v57  ;;  %v383_v56 = vrot.slane %v352_v27, %v382_v52  ;;  %v379_v57 = vrot.slane %v352_v27, %v378_v53 }
 0x21c   :  { %1090 = vmatprep.subr.bf16.mxu0 %v1540_v58  ;;  %1133 = vmatprep.subr.bf16.mxu1 %v1653_v11  ;;  %v387_v58 = vrot.slane %v352_v27, %v386_v54 }
 0x21e   :  { %1037 = vmatmul.mubr.bf16.vlgmr.msra.gmra.mrb[8].mxu0 %v1751_v22  ;;  %1080 = vmatmul.mubr.bf16.vlgmr.msra.gmra.mrb[8].mxu1 %v1751_v22 }
 0x21f   :  { %1091 = vmatpush1.bf16.msra.mxu0 %v1538_v59  ;;  %1376 = vmatprep.mubr.msk.bf16.mxu0 %vm88_vm1, %v1753_v23 }
 0x220   :  { %1134 = vmatpush1.bf16.msra.mxu1 %v1541_v60  ;;  %1377 = vmatprep.mubr.msk.bf16.mxu1 %vm88_vm1, %v1753_v23  ;;  %v1572_v23 = vld [vmem:[#allocation6 + $0x2e4] ss:$44 sps:$4 sm:$0xff]  }
 0x221   :  { %1092 = vmatprep.subr.bf16.mxu0 %v1544_v61  ;;  %1135 = vmatprep.subr.bf16.mxu1 %v1653_v11 }
 0x223   :  { %1093 = vmatpush1.bf16.msra.mxu0 %v1542_v62 }
 0x224   :  { %1136 = vmatpush1.bf16.msra.mxu1 %v1545_v1  ;;  %1094 = vmatprep.subr.bf16.mxu0 %v1548_v3 }
 0x225   :  { %1137 = vmatprep.subr.bf16.mxu1 %v1653_v11 }
 0x227   :  { %1095 = vmatpush1.bf16.msra.mxu0 %v1546_v4 }
 0x228   :  { %1138 = vmatpush1.bf16.msra.mxu1 %v1549_v5  ;;  %1096 = vmatprep.subr.bf16.mxu0 %v1552_v6 }
 0x229   :  { %1139 = vmatprep.subr.bf16.mxu1 %v1653_v11 }
 0x22b   :  { %1097 = vmatpush1.bf16.msra.mxu0 %v1550_v7 }
 0x22c   :  { %1140 = vmatpush1.bf16.msra.mxu1 %v1553_v8  ;;  %1098 = vmatprep.subr.bf16.mxu0 %v1556_v9 }
 0x22d   :  { %1141 = vmatprep.subr.bf16.mxu1 %v1653_v11 }
 0x22f   :  { %1099 = vmatpush1.bf16.msra.mxu0 %v1554_v10 }
 0x230   :  { %1142 = vmatpush1.bf16.msra.mxu1 %v1557_v12  ;;  %1100 = vmatprep.subr.bf16.mxu0 %v1560_v13 }
 0x231   :  { %1143 = vmatprep.subr.bf16.mxu1 %v1653_v11 }
 0x233   :  { %1101 = vmatpush1.bf16.msra.mxu0 %v1558_v14 }
 0x234   :  { %1144 = vmatpush1.bf16.msra.mxu1 %v1561_v15  ;;  %1102 = vmatprep.subr.bf16.mxu0 %v1564_v16 }
 0x235   :  { %1145 = vmatprep.subr.bf16.mxu1 %v1653_v11 }
 0x237   :  { %1103 = vmatpush1.bf16.msra.mxu0 %v1562_v17 }
 0x238   :  { %1146 = vmatpush1.bf16.msra.mxu1 %v1565_v18  ;;  %1104 = vmatprep.subr.bf16.mxu0 %v1568_v19  ;;  %v353_v19 = vld [vmem:[%s1844_s6 + $0x8] sm:$0x7] }
 0x239   :  { %1147 = vmatprep.subr.bf16.mxu1 %v1653_v11 }
 0x23b   :  { %1105 = vmatpush1.bf16.msra.mxu0 %v1566_v20  ;;  %v391_v20 = vrot.slane %v353_v19, %v1741_v0 }
 0x23c   :  { %1148 = vmatpush1.bf16.msra.mxu1 %v1569_v21  ;;  %1106 = vmatprep.subr.bf16.mxu0 %v1572_v23  ;;  %v399_v21 = vrot.slane %v353_v19, %v366_v26  ;;  %v395_v23 = vrot.slane %v353_v19, %v1747_v2 }
 0x23d   :  { %1149 = vmatprep.subr.bf16.mxu1 %v1653_v11  ;;  %v363_v11 = vrot.slane %v352_v27, %v1747_v2 }
 0x23f   :  { %1107 = vmatpush1.bf16.msra.mxu0 %v1570_v24 }
 0x240   :  { %1150 = vmatpush1.bf16.msra.mxu1 %v1573_v25 }
 0x242   :  { %1123 = vmatmul.mubr.bf16.vlgmr.msra.gmra.mrb[12].mxu0 %v1751_v22 }
 0x243   :  { %1166 = vmatmul.mubr.bf16.vlgmr.msra.gmra.mrb[12].mxu1 %v1751_v22 }
 0x2cd   :  { %v952_v32 = vpop.f32.mrb[4].mxu0  ;;  %v995_v33 = vpop.f32.mrb[4].mxu1 }
 0x2ce   :  { %v953_v34 = vadd.f32 %v952_v32, %v359_v29  ;;  %v996_v22 = vadd.f32 %v995_v33, %v367_v30  ;;  %v954_v35 = vpop.f32.mrb[5].mxu0  ;;  %v997_v36 = vpop.f32.mrb[5].mxu1 }
 0x2cf   :  { %v955_v37 = vadd.f32 %v954_v35, %v363_v11  ;;  %v998_v38 = vadd.f32 %v997_v36, %v371_v31  ;;  %v956_v39 = vpop.f32.mrb[6].mxu0  ;;  %v999_v40 = vpop.f32.mrb[6].mxu1 }
 0x2d0   :  { %v957_v41 = vadd.f32 %v956_v39, %v359_v29  ;;  %v1000_v42 = vadd.f32 %v999_v40, %v367_v30  ;;  %v958_v43 = vpop.f32.mrb[7].mxu0  ;;  %v1001_v44 = vpop.f32.mrb[7].mxu1 }
 0x2d1   :  { %v1390_v45 = vpack.c.bf16 %v955_v37, %v953_v34  ;;  %v1391_v46 = vpack.c.bf16 %v998_v38, %v996_v22  ;;  %v959_v47 = vadd.f32 %v958_v43, %v363_v11  ;;  %v1002_v48 = vadd.f32 %v1001_v44, %v371_v31 }
 0x2d3   :  { %1242 = vst [vmem:[%s1845_s7] sm:$0xff] %v1390_v45  ;;  %1243 = vst [vmem:[%s1845_s7 + $0x8] sm:$0xff] %v1391_v46  ;;  %v1396_v49 = vpack.c.bf16 %v959_v47, %v957_v41  ;;  %v1397_v50 = vpack.c.bf16 %v1002_v48, %v1000_v42 }
 0x2d5   :  { %1249 = vst [vmem:[%s1845_s7 + $0x2c] sm:$0xff] %v1396_v49  ;;  %1250 = vst [vmem:[%s1845_s7 + $0x34] sm:$0xff] %v1397_v50 }
 0x2f1   :  { %v1038_v59 = vpop.f32.mrb[8].mxu0  ;;  %v1081_v60 = vpop.f32.mrb[8].mxu1 }
 0x2f2   :  { %v1039_v61 = vadd.f32 %v1038_v59, %v375_v55  ;;  %v1082_v62 = vadd.f32 %v1081_v60, %v383_v56  ;;  %v1040_v1 = vpop.f32.mrb[9].mxu0  ;;  %v1083_v3 = vpop.f32.mrb[9].mxu1 }
 0x2f3   :  { %v1041_v4 = vadd.f32 %v1040_v1, %v379_v57  ;;  %v1084_v5 = vadd.f32 %v1083_v3, %v387_v58  ;;  %v1042_v6 = vpop.f32.mrb[10].mxu0  ;;  %v1085_v7 = vpop.f32.mrb[10].mxu1 }
 0x2f4   :  { %v1043_v8 = vadd.f32 %v1042_v6, %v375_v55  ;;  %v1086_v9 = vadd.f32 %v1085_v7, %v383_v56  ;;  %v1044_v10 = vpop.f32.mrb[11].mxu0  ;;  %v1087_v12 = vpop.f32.mrb[11].mxu1 }
 0x2f5   :  { %v1392_v13 = vpack.c.bf16 %v1041_v4, %v1039_v61  ;;  %v1393_v14 = vpack.c.bf16 %v1084_v5, %v1082_v62  ;;  %v1045_v15 = vadd.f32 %v1044_v10, %v379_v57  ;;  %v1088_v16 = vadd.f32 %v1087_v12, %v387_v58 }
 0x2f7   :  { %1244 = vst [vmem:[%s1845_s7 + $0x10] sm:$0xff] %v1392_v13  ;;  %1245 = vst [vmem:[%s1845_s7 + $0x18] sm:$0xff] %v1393_v14  ;;  %v1398_v17 = vpack.c.bf16 %v1045_v15, %v1043_v8  ;;  %v1399_v18 = vpack.c.bf16 %v1088_v16, %v1086_v9 }
 0x2f9   :  { %1251 = vst [vmem:[%s1845_s7 + $0x3c] sm:$0xff] %v1398_v17  ;;  %1252 = vst [vmem:[%s1845_s7 + $0x44] sm:$0xff] %v1399_v18 }
 0x315   :  { %v1124_v24 = vpop.f32.mrb[12].mxu0 }
 0x316   :  { %v1125_v25 = vadd.f32 %v1124_v24, %v391_v20  ;;  %v1167_v27 = vpop.f32.mrb[12].mxu1  ;;  %v1126_v28 = vpop.f32.mrb[13].mxu0 }
 0x317   :  { %v1168_v29 = vadd.f32 %v1167_v27, %v399_v21  ;;  %v1127_v30 = vadd.f32 %v1126_v28, %v395_v23  ;;  %v1169_v11 = vpop.f32.mrb[13].mxu1  ;;  %v1128_v31 = vpop.f32.mrb[14].mxu0 }
 0x318   :  { %v1129_v32 = vadd.f32 %v1128_v31, %v391_v20  ;;  %v1170_v33 = vpop.f32.mrb[14].mxu1  ;;  %v1130_v34 = vpop.f32.mrb[15].mxu0 }
 0x319   :  { %v1395_v22 = vpack.c.bf16 %v1168_v29, %v1168_v29  ;;  %v1394_v35 = vpack.c.bf16 %v1127_v30, %v1125_v25  ;;  %v1171_v0 = vadd.f32 %v1170_v33, %v399_v21  ;;  %v1131_v36 = vadd.f32 %v1130_v34, %v395_v23  ;;  %v1172_v63 = vpop.f32.mrb[15].mxu1 }
 0x31b   :  { %1248 = vst.msk [vmem:[%s1845_s7 + $0x28] sm:$0xf] %vm1247_vm4, %v1395_v22  ;;  %1246 = vst [vmem:[%s1845_s7 + $0x20] sm:$0xff] %v1394_v35  ;;  %v1401_v2 = vpack.c.bf16 %v1171_v0, %v1171_v0  ;;  %v1400_v26 = vpack.c.bf16 %v1131_v36, %v1129_v32 }
 0x31d   :  { %1254 = vst.msk [vmem:[%s1845_s7 + $0x54] sm:$0xf] %vm1247_vm4, %v1401_v2  ;;  %1253 = vst [vmem:[%s1845_s7 + $0x4c] sm:$0xff] %v1400_v26 }
 0x31e   :  { %1259 = vsyncpa [#allocation3], 1 }
 0x31f   :  { %1260 = vsyncpa [#allocation5], 1 }

</bundles_post_ra>
